<compile_context>
chip_gen: v5e
topology: v5e:2x2
jax: 0.10.0
libtpu: 0.0.40
codegen_flags: <defaults>
</compile_context>

<pallas_src>
import functools

import jax
import jax.numpy as jnp
from jax.experimental import pallas as pl
from jax.experimental.pallas import tpu as pltpu


def _dice_kernel(labels_ref, preds_ref, dice_ref, tp_ref, psum_ref, cnt_ref,
                 *, delta, hw, tile, needs_tail):
    s = pl.program_id(1)

    @pl.when(s == 0)
    def _():
        tp_ref[...] = jnp.zeros_like(tp_ref)
        psum_ref[...] = jnp.zeros_like(psum_ref)
        cnt_ref[...] = jnp.zeros_like(cnt_ref)

    preds = preds_ref[...]                     # (1, C, TS), input dtype
    labels = labels_ref[...]                   # (1, 1, TS) int32
    _, c, ts = preds.shape

    # In-kernel one-hot mask: mask[0, k, s] = (labels[0, 0, s] == k).
    # labels broadcasts over the C (sublane) axis; iota is vreg-cheap.
    cls = jax.lax.broadcasted_iota(jnp.int32, (1, c, ts), 1)
    mask = labels == cls                       # (1, C, TS) bool

    if needs_tail:
        # Last tile may extend past H*W; zero out the out-of-range lanes
        # (their VMEM contents are unspecified).
        lane = jax.lax.broadcasted_iota(jnp.int32, (1, c, ts), 2)
        valid = (s * tile + lane) < hw
        mask = jnp.logical_and(mask, valid)
        preds = jnp.where(valid, preds, 0.0)

    # Lane-axis reductions lower to a VALU add tree + one XLU cross-lane reduce
    # per row group; accumulate partials in f32 for bf16-safety.
    tp_ref[...] += jnp.sum(jnp.where(mask, preds, 0.0).astype(jnp.float32), axis=2)
    psum_ref[...] += jnp.sum(preds.astype(jnp.float32), axis=2)
    cnt_ref[...] += jnp.sum(jnp.where(mask, 1.0, 0.0), axis=2)

    @pl.when(s == pl.num_programs(1) - 1)
    def _():
        tp = tp_ref[...]
        fn = cnt_ref[...] - tp                 # == sum(onehot * (1 - preds))
        fp = psum_ref[...] - tp                # == sum((1 - onehot) * preds)
        dice = (tp + 1e-6) / (tp + delta * fn + (1.0 - delta) * fp + 1e-6)
        dice_ref[...] = dice[:, None, :]       # (1, 1, C)


def _pick_spatial_tile(hw, c, itemsize, max_tile=32768, budget_bytes=24 << 20):
    """Largest lane-dense tile (multiple of 128, <= hw) fitting the VMEM budget."""
    if hw <= 128:
        return hw                              # full extent (lane dim == array dim)
    tile = min((hw // 128) * 128, max_tile)
    # Shrink to fit double-buffered preds + labels blocks (rarely binds).
    while tile > 128 and 2 * (c * tile * itemsize + tile * 4) > budget_bytes:
        tile -= 128
    # Prefer a nearby tile that divides hw exactly (skips tail masking).
    if hw % tile != 0:
        for t in range(tile, max(tile // 2, 127), -128):
            if hw % t == 0:
                tile = t
                break
    return tile


def dice_loss_pallas(preds, labels, *, delta=0.5, weighted=False, spatial_tile=None):
    """preds: (N, C, H, W) float; labels: (N, H, W) int. Returns scalar loss."""
    # TODO(synk): `weighted=True` path needs `class_weights`, which is not defined
    # in the provided module source; only the weighted=False path is implemented.
    assert not weighted, "weighted=True path not implemented (class_weights undefined)"

    N, C, H, W = preds.shape
    HW = H * W
    itemsize = jnp.dtype(preds.dtype).itemsize

    preds_f = preds.reshape(N, C, HW)
    labels_f = labels.reshape(N, 1, HW).astype(jnp.int32)

    if spatial_tile is None:
        spatial_tile = _pick_spatial_tile(HW, C, itemsize)
    spatial_tile = int(min(spatial_tile, HW))
    num_tiles = pl.cdiv(HW, spatial_tile)
    needs_tail = (num_tiles * spatial_tile) != HW

    # Explicit scoped-VMEM limit derived from the chosen blocks (double-buffered
    # preds + labels, plus headroom), clamped safely under v7x's 64 MiB.
    per_step_bytes = C * spatial_tile * itemsize + spatial_tile * 4
    vmem_limit = int(min(max(4 * per_step_bytes + (2 << 20), 16 << 20), 60 << 20))

    dice = pl.pallas_call(
        functools.partial(_dice_kernel, delta=float(delta), hw=HW,
                          tile=spatial_tile, needs_tail=needs_tail),
        out_shape=jax.ShapeDtypeStruct((N, 1, C), jnp.float32),
        grid_spec=pltpu.PrefetchScalarGridSpec(
            num_scalar_prefetch=0,
            grid=(N, num_tiles),
            in_specs=[
                pl.BlockSpec((1, 1, spatial_tile), lambda b, s: (b, 0, s)),   # labels
                pl.BlockSpec((1, C, spatial_tile), lambda b, s: (b, 0, s)),   # preds
            ],
            out_specs=pl.BlockSpec((1, 1, C), lambda b, s: (b, 0, 0)),        # dice
            scratch_shapes=[
                pltpu.VMEM((1, C), jnp.float32),  # tp accumulator
                pltpu.VMEM((1, C), jnp.float32),  # sum(preds) accumulator
                pltpu.VMEM((1, C), jnp.float32),  # class-count accumulator
            ],
        ),
        compiler_params=pltpu.CompilerParams(
            dimension_semantics=("parallel", "arbitrary"),
            vmem_limit_bytes=vmem_limit,
        ),
    )(labels_f, preds_f).reshape(N, C)

    weights = 1.0  # weighted=False
    return (weights * (1.0 - jnp.mean(dice, axis=0))).mean()


def dice_loss_ref(preds, labels, *, delta=0.5):
    """Pure-JAX reference mirroring the PyTorch forward (weighted=False)."""
    C = preds.shape[1]
    onehot = jax.nn.one_hot(labels, C, dtype=preds.dtype)            # (N, H, W, C)
    onehot = jnp.transpose(onehot, (0, 3, 1, 2))                     # (N, C, H, W)
    tp = jnp.sum(onehot * preds, axis=(2, 3))
    fn = jnp.sum(onehot * (1.0 - preds), axis=(2, 3))
    fp = jnp.sum((1.0 - onehot) * preds, axis=(2, 3))
    dice = (tp + 1e-6) / (tp + delta * fn + (1.0 - delta) * fp + 1e-6)
    return (1.0 - jnp.mean(dice, axis=0)).mean()


if __name__ == "__main__":
    key = jax.random.PRNGKey(0)
    k1, k2, k3, k4 = jax.random.split(key, 4)

    # Case 1: tile divides H*W exactly.
    N, C, H, W = 2, 4, 16, 16
    logits = jax.random.normal(k1, (N, C, H, W), dtype=jnp.float32)
    preds = jax.nn.softmax(logits, axis=1)                           # (N, C, H, W)
    labels = jax.random.randint(k2, (N, H, W), 0, C, dtype=jnp.int32)

    loss = jax.block_until_ready(dice_loss_pallas(preds, labels, delta=0.5))
    ref = jax.block_until_ready(dice_loss_ref(preds, labels, delta=0.5))
    assert jnp.allclose(loss, ref, atol=1e-5, rtol=1e-5), (loss, ref)

    # Case 2: H*W not a multiple of the tile (exercises cdiv grid + tail masking).
    N2, C2, H2, W2 = 2, 3, 18, 18                                    # HW = 324
    logits2 = jax.random.normal(k3, (N2, C2, H2, W2), dtype=jnp.float32)
    preds2 = jax.nn.softmax(logits2, axis=1)
    labels2 = jax.random.randint(k4, (N2, H2, W2), 0, C2, dtype=jnp.int32)

    loss2 = jax.block_until_ready(dice_loss_pallas(preds2, labels2, delta=0.3))
    ref2 = jax.block_until_ready(dice_loss_ref(preds2, labels2, delta=0.3))
    assert jnp.allclose(loss2, ref2, atol=1e-5, rtol=1e-5), (loss2, ref2)

    print("KERNEL_OK")
</pallas_src>

<mosaic_0001>
module attributes {stable_mosaic.version = 11 : i64} {
  func.func @_dice_kernel(%arg0: i32, %arg1: i32, %arg2: memref<1x1x256xi32, #tpu.memory_space<vmem>>, %arg3: memref<1x4x256xf32, #tpu.memory_space<vmem>>, %arg4: memref<1x1x4xf32, #tpu.memory_space<vmem>>, %arg5: memref<1x4xf32, #tpu.memory_space<vmem>>, %arg6: memref<1x4xf32, #tpu.memory_space<vmem>>, %arg7: memref<1x4xf32, #tpu.memory_space<vmem>>) attributes {dimension_semantics = [#tpu.dimension_semantics<parallel>, #tpu.dimension_semantics<arbitrary>], iteration_bounds = array<i64: 2, 1>, scalar_prefetch = 0 : i64, scratch_operands = 3 : i64, tpu.core_type = #tpu.core_type<tc>, window_params = [{transform_indices = @transform_0, window_bounds = array<i64: 1, 1, 256>}, {transform_indices = @transform_1, window_bounds = array<i64: 1, 4, 256>}, {transform_indices = @transform_2, window_bounds = array<i64: 1, 1, 4>}]} {
    %c0_i32 = arith.constant 0 : i32
    %0 = arith.cmpi eq, %arg1, %c0_i32 : i32
    %1 = arith.extui %0 : i1 to i32
    %c0_i32_0 = arith.constant 0 : i32
    %2 = arith.cmpi ne, %1, %c0_i32_0 : i32
    scf.if %2 {
      %cst_25 = arith.constant 0.000000e+00 : f32
      %28 = vector.broadcast %cst_25 : f32 to vector<1x4xf32>
      %c0_26 = arith.constant 0 : index
      %c0_27 = arith.constant 0 : index
      %29 = vector.load %arg5[%c0_26, %c0_27] : memref<1x4xf32, #tpu.memory_space<vmem>>, vector<1x4xf32>
      tpu.vector_store %arg5[%c0_26, %c0_27], %28 {strides = array<i32>} : memref<1x4xf32, #tpu.memory_space<vmem>>, vector<1x4xf32>,
      %cst_28 = arith.constant 0.000000e+00 : f32
      %30 = vector.broadcast %cst_28 : f32 to vector<1x4xf32>
      %c0_29 = arith.constant 0 : index
      %c0_30 = arith.constant 0 : index
      %31 = vector.load %arg6[%c0_29, %c0_30] : memref<1x4xf32, #tpu.memory_space<vmem>>, vector<1x4xf32>
      tpu.vector_store %arg6[%c0_29, %c0_30], %30 {strides = array<i32>} : memref<1x4xf32, #tpu.memory_space<vmem>>, vector<1x4xf32>,
      %cst_31 = arith.constant 0.000000e+00 : f32
      %32 = vector.broadcast %cst_31 : f32 to vector<1x4xf32>
      %c0_32 = arith.constant 0 : index
      %c0_33 = arith.constant 0 : index
      %33 = vector.load %arg7[%c0_32, %c0_33] : memref<1x4xf32, #tpu.memory_space<vmem>>, vector<1x4xf32>
      tpu.vector_store %arg7[%c0_32, %c0_33], %32 {strides = array<i32>} : memref<1x4xf32, #tpu.memory_space<vmem>>, vector<1x4xf32>,
    } else {
    }
    %c0 = arith.constant 0 : index
    %c0_1 = arith.constant 0 : index
    %c0_2 = arith.constant 0 : index
    %3 = vector.load %arg3[%c0, %c0_1, %c0_2] : memref<1x4x256xf32, #tpu.memory_space<vmem>>, vector<1x4x256xf32>
    %c0_3 = arith.constant 0 : index
    %c0_4 = arith.constant 0 : index
    %c0_5 = arith.constant 0 : index
    %4 = vector.load %arg2[%c0_3, %c0_4, %c0_5] : memref<1x1x256xi32, #tpu.memory_space<vmem>>, vector<1x1x256xi32>
    %5 = tpu.iota {dimensions = array<i32: 1>} : vector<1x4x256xi32>
    %6 = vector.broadcast %4 : vector<1x1x256xi32> to vector<1x4x256xi32>
    %7 = arith.cmpi eq, %6, %5 : vector<1x4x256xi32>
    %c0_6 = arith.constant 0 : index
    %c0_7 = arith.constant 0 : index
    %8 = vector.load %arg5[%c0_6, %c0_7] : memref<1x4xf32, #tpu.memory_space<vmem>>, vector<1x4xf32>
    %cst = arith.constant 0.000000e+00 : f32
    %9 = vector.broadcast %cst : f32 to vector<1x4x256xf32>
    %10 = arith.select %7, %3, %9 : vector<1x4x256xi1>, vector<1x4x256xf32>
    %cst_8 = arith.constant dense<0.000000e+00> : vector<1x4xf32>
    %11 = vector.multi_reduction <add>, %10, %cst_8 [2] : vector<1x4x256xf32> to vector<1x4xf32>
    %12 = arith.addf %8, %11 : vector<1x4xf32>
    %c0_9 = arith.constant 0 : index
    %c0_10 = arith.constant 0 : index
    %13 = vector.load %arg5[%c0_9, %c0_10] : memref<1x4xf32, #tpu.memory_space<vmem>>, vector<1x4xf32>
    tpu.vector_store %arg5[%c0_9, %c0_10], %12 {strides = array<i32>} : memref<1x4xf32, #tpu.memory_space<vmem>>, vector<1x4xf32>,
    %c0_11 = arith.constant 0 : index
    %c0_12 = arith.constant 0 : index
    %14 = vector.load %arg6[%c0_11, %c0_12] : memref<1x4xf32, #tpu.memory_space<vmem>>, vector<1x4xf32>
    %cst_13 = arith.constant dense<0.000000e+00> : vector<1x4xf32>
    %15 = vector.multi_reduction <add>, %3, %cst_13 [2] : vector<1x4x256xf32> to vector<1x4xf32>
    %16 = arith.addf %14, %15 : vector<1x4xf32>
    %c0_14 = arith.constant 0 : index
    %c0_15 = arith.constant 0 : index
    %17 = vector.load %arg6[%c0_14, %c0_15] : memref<1x4xf32, #tpu.memory_space<vmem>>, vector<1x4xf32>
    tpu.vector_store %arg6[%c0_14, %c0_15], %16 {strides = array<i32>} : memref<1x4xf32, #tpu.memory_space<vmem>>, vector<1x4xf32>,
    %c0_16 = arith.constant 0 : index
    %c0_17 = arith.constant 0 : index
    %18 = vector.load %arg7[%c0_16, %c0_17] : memref<1x4xf32, #tpu.memory_space<vmem>>, vector<1x4xf32>
    %cst_18 = arith.constant 1.000000e+00 : f32
    %cst_19 = arith.constant 0.000000e+00 : f32
    %19 = vector.broadcast %cst_18 : f32 to vector<1x4x256xf32>
    %20 = vector.broadcast %cst_19 : f32 to vector<1x4x256xf32>
    %21 = arith.select %7, %19, %20 : vector<1x4x256xi1>, vector<1x4x256xf32>
    %cst_20 = arith.constant dense<0.000000e+00> : vector<1x4xf32>
    %22 = vector.multi_reduction <add>, %21, %cst_20 [2] : vector<1x4x256xf32> to vector<1x4xf32>
    %23 = arith.addf %18, %22 : vector<1x4xf32>
    %c0_21 = arith.constant 0 : index
    %c0_22 = arith.constant 0 : index
    %24 = vector.load %arg7[%c0_21, %c0_22] : memref<1x4xf32, #tpu.memory_space<vmem>>, vector<1x4xf32>
    tpu.vector_store %arg7[%c0_21, %c0_22], %23 {strides = array<i32>} : memref<1x4xf32, #tpu.memory_space<vmem>>, vector<1x4xf32>,
    %c0_i32_23 = arith.constant 0 : i32
    %25 = arith.cmpi eq, %arg1, %c0_i32_23 : i32
    %26 = arith.extui %25 : i1 to i32
    %c0_i32_24 = arith.constant 0 : i32
    %27 = arith.cmpi ne, %26, %c0_i32_24 : i32
    scf.if %27 {
      %c0_25 = arith.constant 0 : index
      %c0_26 = arith.constant 0 : index
      %28 = vector.load %arg5[%c0_25, %c0_26] : memref<1x4xf32, #tpu.memory_space<vmem>>, vector<1x4xf32>
      %c0_27 = arith.constant 0 : index
      %c0_28 = arith.constant 0 : index
      %29 = vector.load %arg7[%c0_27, %c0_28] : memref<1x4xf32, #tpu.memory_space<vmem>>, vector<1x4xf32>
      %30 = arith.subf %29, %28 : vector<1x4xf32>
      %c0_29 = arith.constant 0 : index
      %c0_30 = arith.constant 0 : index
      %31 = vector.load %arg6[%c0_29, %c0_30] : memref<1x4xf32, #tpu.memory_space<vmem>>, vector<1x4xf32>
      %32 = arith.subf %31, %28 : vector<1x4xf32>
      %cst_31 = arith.constant 9.99999997E-7 : f32
      %33 = vector.broadcast %cst_31 : f32 to vector<1x4xf32>
      %34 = arith.addf %28, %33 : vector<1x4xf32>
      %cst_32 = arith.constant 5.000000e-01 : f32
      %35 = vector.broadcast %cst_32 : f32 to vector<1x4xf32>
      %36 = arith.mulf %35, %30 : vector<1x4xf32>
      %37 = arith.addf %28, %36 : vector<1x4xf32>
      %cst_33 = arith.constant 5.000000e-01 : f32
      %38 = vector.broadcast %cst_33 : f32 to vector<1x4xf32>
      %39 = arith.mulf %38, %32 : vector<1x4xf32>
      %40 = arith.addf %37, %39 : vector<1x4xf32>
      %cst_34 = arith.constant 9.99999997E-7 : f32
      %41 = vector.broadcast %cst_34 : f32 to vector<1x4xf32>
      %42 = arith.addf %40, %41 : vector<1x4xf32>
      %43 = arith.divf %34, %42 : vector<1x4xf32>
      %44 = vector.shape_cast %43 : vector<1x4xf32> to vector<1x1x4xf32>
      %c0_35 = arith.constant 0 : index
      %c0_36 = arith.constant 0 : index
      %c0_37 = arith.constant 0 : index
      %45 = vector.load %arg4[%c0_35, %c0_36, %c0_37] : memref<1x1x4xf32, #tpu.memory_space<vmem>>, vector<1x1x4xf32>
      tpu.vector_store %arg4[%c0_35, %c0_36, %c0_37], %44 {strides = array<i32>} : memref<1x1x4xf32, #tpu.memory_space<vmem>>, vector<1x1x4xf32>,
    } else {
    }
    return
  }
  func.func @transform_0(%arg0: i32, %arg1: i32) -> (i32, i32, i32) {
    %c0_i32 = arith.constant 0 : i32
    %c0_i32_0 = arith.constant 0 : i32
    return %arg0, %c0_i32, %arg1 : i32, i32, i32
  }
  func.func @transform_1(%arg0: i32, %arg1: i32) -> (i32, i32, i32) {
    %c0_i32 = arith.constant 0 : i32
    %c0_i32_0 = arith.constant 0 : i32
    return %arg0, %c0_i32, %arg1 : i32, i32, i32
  }
  func.func @transform_2(%arg0: i32, %arg1: i32) -> (i32, i32, i32) {
    %c0_i32 = arith.constant 0 : i32
    %c0_i32_0 = arith.constant 0 : i32
    %c0_i32_1 = arith.constant 0 : i32
    return %arg0, %c0_i32, %c0_i32_0 : i32, i32, i32
  }
}

</mosaic_0001>

<bundles_post_ra>
// kernel: tpu_custom_call.1
= control target key start
LH: loop header
LB: loop body
LE: loop exit
PB: predicated region body
PF: predicated region fallthrough
CT: control target
= control target key end

     0   :  { %7 = vsyncpa [#allocation6], 0  ;;  %s886_s0 = inlined_call_operand.hbm [shape: s32[2,1,256], index: 0, kind: input, shape index: {}]   ;;  %s887_s1 = inlined_call_operand.hbm [shape: f32[2,4,256], index: 1, kind: input, shape index: {}]   ;;  %s888_s2 = inlined_call_operand.hbm [shape: f32[2,1,4], index: 2, kind: output, shape index: {}]  }
   0x1   :  { %9 = vsyncpa [#allocation6 + $0x1], 0 }
   0x2   :  { %10 = vsyncpa [#allocation9], 0 }
   0x3   :  { %12 = vsyncpa [#allocation9 + $0x1], 0 }
   0x4   :  { %13 = vsyncpa [#allocation7], 0 }
   0x5   :  { %15 = vsyncpa [#allocation7 + $0x1], 0  ;;  %s734_s9 = smov 0   ;;  %s736_s10 = smov 0  }
   0x6   :  { %s738_s11 = smov 0   ;;  %s740_s12 = smov 0  }
   0x7   :  { %s742_s13 = smov 0   ;;  %s744_s14 = smov 0  }
   0x8 LB: > { %s480_s15 = sadd.s32 4294967295, %s715_s14   ;;  %s481_s16 = sadd.s32 4294967294, %s715_s14   ;;  %s715_s14 = sphi %s744_s14, %s21_s14   ;;  %s711_s13 = sphi %s742_s13, %s898_s13   ;;  %s707_s12 = sphi %s740_s12, %s897_s12   ;;  %s703_s11 = sphi %s738_s11, %s896_s11   ;;  %s699_s10 = sphi %s736_s10, %s895_s10   ;;  %s695_s9 = sphi %s734_s9, %s894_s9  }
   0x9   : > { %s33_s17 = sadd.s32 1, %s711_s13  ;;  %s42_s18 = sadd.s32 1, %s703_s11 }
   0xa   : > { %p35_p0 = scmp.ge.s32.totalorder %s33_s17, 2  ;;  %p49_p1 = scmp.ne.s32.totalorder %s703_s11, %s699_s10 }
   0xb   : > { %p50_p2 = scmp.eq.s32.totalorder %s715_s14, 0  ;;  %p55_p3 = scmp.ne.s32.totalorder %s699_s10, %s695_s9 }
   0xc   : > { %s900_s17 = smov (%p35_p0, %s33_s17), 0  ;;  %p56_p5 = scmp.eq.s32.totalorder %s480_s15, 0 }
   0xd   : > { %p775_p4 = por %p50_p2, %p49_p1  ;;  %s37_s20 = ssub.s32 %s711_s13, %s900_s17 }
   0xe   : > { %p107_p6 = scmp.eq.s32.totalorder %s480_s15, 1  ;;  %p40_p7 = scmp.eq.s32.totalorder %s37_s20, 0 }
   0xf   : > { %p781_p8 = por %p56_p5, %p55_p3  ;;  %p113_p10 = scmp.eq.s32.totalorder %s481_s16, 1 }
  0x10   : > { %p785_p9 = por %p107_p6, %p49_p1  ;;  %p483_p12 = scmp.ge.s32.totalorder %s715_s14, 2 }
  0x11   : > { %s790_s23 = scalar_select %p40_p7, %s703_s11, %s42_s18  }
  0x12   : > { %p792_p11 = por %p113_p10, %p55_p3  ;;  %p512_p13 = scmp.lt.s32.totalorder %s715_s14, 2 }
  0x13   : > { %s133_s25 = sand.u32 1, %s703_s11   ;;  %s485_s27 = sshll.u32 %s711_s13, 1 }
  0x14   : > { %s484_s26 = sshll.u32 %s133_s25, 1  ;;  %s143_s30 = scalar_lea.hbm %s886_s0, %s485_s27 }
  0x15   : > { %s137_s3 = scalar_lea.vmem [#allocation5], %s484_s26  ;;  %s145_s5 = sshll.u32 %s143_s30, 4  ;;  %s146_s5 = int_to_ptr.hbm [resolvable:$true] %s145_s5 }
  0x16   : > { %s147_s4 = sshll.u32 %s137_s3, 4  ;;  %p805_p0 = pnand %p512_p13, %p775_p4  ;;  %s148_s4 = int_to_ptr.vmem [resolvable:$true] %s147_s4 }
  0x17   : > { %p489_p1 = scmp.ge.s32.totalorder %s715_s14, 1  ;;  %p174_p2 = scmp.lt.s32.totalorder %s715_s14, 3 }
  0x18   : > { %s134_s7 = scalar_lea.sflag [#allocation6], %s133_s25  ;;  %s486_s8 = sshll.u32 %s133_s25, 3 }
  0x19   : > { %504 = dma.hbm_to_vmem [thread:$0]  (!%p805_p0), %s146_s5, 32, %s148_s4, %s134_s7  }
  0x1a   : > { %p175_p3 = pnand %p489_p1, %p174_p2  ;;  %s494_s15 = sshll.u32 %s711_s13, 3 }
  0x1b   : > { %s165_s20 = scalar_lea.hbm %s887_s1, %s494_s15  ;;  %s158_s26 = scalar_lea.vmem [#allocation8], %s486_s8 }
  0x1c   : > { %s169_s19 = sshll.u32 %s158_s26, 4  ;;  %s167_s27 = sshll.u32 %s165_s20, 4  ;;  %s170_s19 = int_to_ptr.vmem [resolvable:$true] %s169_s19  ;;  %s168_s27 = int_to_ptr.hbm [resolvable:$true] %s167_s27 }
  0x1d   : > { %s155_s28 = scalar_lea.sflag [#allocation9], %s133_s25  ;;  %178 = sbr.rel (%p175_p3) target bundleno = 475 (0x1db), region = 28 }
  0x1e   : > { %507 = dma.hbm_to_vmem [thread:$0]  (!%p805_p0), %s168_s27, 128, %s170_s19, %s155_s28  }
  0x1f   : > { %s820_s29 = sand.u32 (!%p175_p3), 1, %s699_s10  }
  0x20   : > { %s490_s30 = sshll.u32 (!%p175_p3), %s820_s29, 1  ;;  %s181_s3 = scalar_lea.sflag (!%p175_p3), [#allocation6], %s820_s29 }
  0x21   : > { %s184_s4 = scalar_lea.vmem (!%p175_p3), [#allocation5], %s490_s30 }
  0x22   : > { %682 = dma.done.wait (%p781_p8), %s181_s3, 32  }
  0x23   : > { %684 = vsyncadd (%p781_p8), %s181_s3, 4294967264  ;;  %s491_s25 = sshll.u32 %s820_s29, 3  ;;  %s191_s5 = scalar_lea.sflag [#allocation9], %s820_s29 }
  0x24   : > { %s194_s6 = scalar_lea.vmem [#allocation8], %s491_s25 }
  0x25   : > { %686 = dma.done.wait (%p781_p8), %s191_s5, 128  }
  0x26   : > { %688 = vsyncadd (%p781_p8), %s191_s5, 4294967168  ;;  %vm226_vm0 = vcmask 24576   ;;  %v717_v0 = vmov 0.0   ;;  %v232_v1 = vlaneseq  ;;  %v230_v3 = vld [vmem:[%s194_s6] sm:$0xff]  ;;  %v231_v4 = vld [vmem:[%s184_s4] sm:$0x3]  ;;  %s374_s8 = scalar_lea.hbm %s888_s2, %s707_s12 }
  0x27   : > { %227 = vst.msk [vmem:[#allocation2] sm:$0x1] %vm226_vm0, %v717_v0  ;;  %v234_v5 = vperm.slane %v231_v4, 0  ;;  %v235_v6 = vperm.slane %v231_v4, 1  ;;  %vm247_vm3 = vcmask 1043456   ;;  %v718_v19 = vmov 0  }
  0x28   : > { %228 = vst.msk [vmem:[#allocation3] sm:$0x1] %vm226_vm0, %v717_v0  ;;  %v233_v2 = vshrl.u32 %v232_v1, 7  ;;  %564 = vset.pattern.permute.xlu1 %v718_v19  ;;  %565 = vset.pattern.permute.xlu2 %v718_v19  ;;  %v270_v32 = vand.u32 127, %v232_v1  ;;  %s219_s15 = scalar_lea.vmem [#allocation10], %s820_s29  ;;  %s378_s18 = sshll.u32 %s374_s8, 4  ;;  %s379_s18 = int_to_ptr.hbm [resolvable:$true] %s378_s18 }
  0x29   : > { %229 = vst.msk [vmem:[#allocation4] sm:$0x1] %vm226_vm0, %v717_v0  ;;  %566 = vset.pattern.permute.xlu0 %v718_v19  ;;  %s376_s16 = sshll.u32 %s219_s15, 4  ;;  %s366_s20 = scalar_lea.sflag [#allocation7], %s820_s29  ;;  %s377_s16 = int_to_ptr.vmem [resolvable:$true] %s376_s16 }
  0x2a   : > { %240 = vst [vmem:[#allocation1] ss:$2 sm:$0xff] %v230_v3  ;;  %vm236_vm1 = vcmp.eq.s32.totalorder %v234_v5, %v233_v2  ;;  %vm237_vm2 = vcmp.eq.s32.totalorder %v235_v6, %v233_v2  ;;  %s643_s12 = sshra.s32 %s379_s18, 4  ;;  %s649_s28 = scalar_lea.hbm %s888_s2, 2  ;;  %s644_s12 = int_to_ptr.hbm [resolvable:$true] %s643_s12 }
  0x2b   : > { %v308_v7 = vsel %vm236_vm1, 1.0, %v717_v0  ;;  %v309_v8 = vsel %vm237_vm2, 1.0, %v717_v0  ;;  %s645_s26 = scalar_lea.hbm %s644_s12, 1  ;;  %p650_p7 = scmp.lt.s32.totalorder %s644_s12, %s888_s2 }
  0x2c   : > { %v310_v9 = vsel %vm247_vm3, %v308_v7, 0.0  ;;  %v311_v10 = vsel %vm247_vm3, %v309_v8, 0.0  ;;  %p646_p4 = scmp.ne.s32.totalorder %s644_s12, %s645_s26  ;;  %p651_p8 = scmp.lt.s32.totalorder %s649_s28, %s645_s26 }
  0x2d   : > { %v312_v11 = vadd.f32 %v311_v10, %v310_v9 }
  0x2e   : > { %v238_v34 = vld [vmem:[#allocation2] sm:$0x1]  ;;  %p647_p5 = pnand %p646_p4, %p785_p9  ;;  %p652_p10 = por %p651_p8, %p650_p7 }
  0x2f   : > { %313 = vadd.xlane.f32.xlu1 %v312_v11  ;;  %v276_v53 = vld [vmem:[#allocation3] sm:$0x1] }
  0x30   : > { %v307_v49 = vld [vmem:[#allocation4] sm:$0x1]  ;;  %p648_p6 = pneg %p647_p5 }
  0x31   : > { %v241_v12 = vld.sshfl [vmem:[#allocation1] sm:$0xff pattern:$0x75316420]  ;;  %v242_v13 = vld.sshfl [vmem:[#allocation1 + $0x8] sm:$0xff pattern:$0x75316420] }
  0x32   : > { %v245_v14 = vsel %vm236_vm1, %v241_v12, 0.0  ;;  %v246_v15 = vsel %vm237_vm2, %v242_v13, 0.0  ;;  %p653_p13 = pnand %p652_p10, %p648_p6 }
  0x33   : > { %v248_v16 = vsel %vm247_vm3, %v245_v14, 0.0  ;;  %v249_v17 = vsel %vm247_vm3, %v246_v15, 0.0 }
  0x34   : > { %v250_v18 = vadd.f32 %v249_v17, %v248_v16 }
  0x36   : > { %251 = vadd.xlane.f32.xlu0 %v250_v18 }
  0xa2   : > { %v314_v31 = vpop.xlane.xlu1 %313 }
  0xa3   : > { %v316_v42 = vperm.slane %v314_v31, 0  ;;  %v317_v43 = vperm.slane %v314_v31, 1  ;;  %v318_v44 = vperm.slane %v314_v31, 2  ;;  %v319_v45 = vperm.slane %v314_v31, 3 }
  0xa9   : > { %v252_v20 = vpop.xlane.xlu0 %251 }
  0xaa   : > { %v254_v21 = vperm.slane %v252_v20, 0  ;;  %v255_v22 = vperm.slane %v252_v20, 1  ;;  %v256_v23 = vperm.slane %v252_v20, 2  ;;  %v257_v24 = vperm.slane %v252_v20, 3 }
  0xac   : > { %258 = vst [vmem:[#allocation1] ss:$9 sm:$0xff] %v254_v21 }
  0xad   : > { %260 = vst [vmem:[#allocation1 + $0x1] ss:$9 sm:$0xff] %v255_v22 }
  0xae   : > { %262 = vst [vmem:[#allocation1 + $0x2] ss:$9 sm:$0xff] %v256_v23 }
  0xaf   : > { %264 = vst [vmem:[#allocation1 + $0x3] ss:$9 sm:$0xff] %v257_v24 }
  0xb6   : > { %v265_v25 = vld [vmem:[#allocation1] sm:$0xff] }
  0xb7   : > { %267 = vperm.xlu1 %564, %v265_v25   ;;  %277 = vst [vmem:[#allocation1] ss:$2 sm:$0xff] %v230_v3 }
  0xbe   : > { %v278_v26 = vld.sshfl [vmem:[#allocation1] sm:$0xff pattern:$0x75316420]  ;;  %v279_v27 = vld.sshfl [vmem:[#allocation1 + $0x8] sm:$0xff pattern:$0x75316420] }
  0xbf   : > { %v282_v28 = vsel %vm247_vm3, %v278_v26, 0.0  ;;  %v283_v29 = vsel %vm247_vm3, %v279_v27, 0.0 }
  0xc0   : > { %v284_v30 = vadd.f32 %v283_v29, %v282_v28 }
  0xc2   : > { %285 = vadd.xlane.f32.xlu0 %v284_v30 }
 0x129   : > { %v268_v33 = vpop.permute.xlu1 %267 }
 0x12a   : > { %v271_v35 = vperm.slane %v268_v33, %v270_v32 }
 0x12c   : > { %v273_v36 = vadd.f32 %v271_v35, %v238_v34 }
 0x12e   : > { %275 = vst.msk [vmem:[#allocation2] sm:$0x1] %vm226_vm0, %v273_v36 }
 0x135   : > { %v286_v37 = vpop.xlane.xlu0 %285  ;;  %v338_v57 = vld [vmem:[#allocation2] sm:$0x1] }
 0x136   : > { %v288_v38 = vperm.slane %v286_v37, 0  ;;  %v289_v39 = vperm.slane %v286_v37, 1  ;;  %v290_v40 = vperm.slane %v286_v37, 2  ;;  %v291_v41 = vperm.slane %v286_v37, 3 }
 0x137   : > { %v343_v10 = vadd.f32 1e-06, %v338_v57 }
 0x138   : > { %292 = vst [vmem:[#allocation1] ss:$9 sm:$0xff] %v288_v38 }
 0x139   : > { %294 = vst [vmem:[#allocation1 + $0x1] ss:$9 sm:$0xff] %v289_v39 }
 0x13a   : > { %296 = vst [vmem:[#allocation1 + $0x2] ss:$9 sm:$0xff] %v290_v40 }
 0x13b   : > { %298 = vst [vmem:[#allocation1 + $0x3] ss:$9 sm:$0xff] %v291_v41 }
 0x142   : > { %v299_v46 = vld [vmem:[#allocation1] sm:$0xff] }
 0x143   : > { %320 = vst [vmem:[#allocation1] ss:$9 sm:$0xff] %v316_v42 }
 0x144   : > { %322 = vst [vmem:[#allocation1 + $0x1] ss:$9 sm:$0xff] %v317_v43 }
 0x145   : > { %324 = vst [vmem:[#allocation1 + $0x2] ss:$9 sm:$0xff] %v318_v44 }
 0x146   : > { %326 = vst [vmem:[#allocation1 + $0x3] ss:$9 sm:$0xff] %v319_v45 }
 0x14d   : > { %v327_v47 = vld [vmem:[#allocation1] sm:$0xff] }
 0x14e   : > { %329 = vperm.xlu2 %565, %v327_v47  }
 0x156   : > { %301 = vperm.xlu2 %565, %v299_v46  }
 0x1a8   : > { %v330_v48 = vpop.permute.xlu2 %329 }
 0x1a9   : > { %v331_v50 = vperm.slane %v330_v48, %v270_v32 }
 0x1ab   : > { %v333_v51 = vadd.f32 %v331_v50, %v307_v49 }
 0x1ad   : > { %334 = vst.msk [vmem:[#allocation4] sm:$0x1] %vm226_vm0, %v333_v51 }
 0x1b0   : > { %v302_v52 = vpop.permute.xlu2 %301 }
 0x1b1   : > { %v303_v54 = vperm.slane %v302_v52, %v270_v32 }
 0x1b3   : > { %v305_v55 = vadd.f32 %v303_v54, %v276_v53 }
 0x1b4   : > { %v339_v56 = vld [vmem:[#allocation4] sm:$0x1] }
 0x1b5   : > { %306 = vst.msk [vmem:[#allocation3] sm:$0x1] %vm226_vm0, %v305_v55  ;;  %v340_v58 = vsub.f32 %v339_v56, %v338_v57 }
 0x1b7   : > { %v344_v59 = vmul.f32 0.5, %v340_v58 }
 0x1b9   : > { %v345_v62 = vadd.f32 %v344_v59, %v338_v57 }
 0x1bc   : > { %v341_v60 = vld [vmem:[#allocation3] sm:$0x1] }
 0x1bd   : > { %v342_v61 = vsub.f32 %v341_v60, %v338_v57 }
 0x1bf   : > { %v346_v63 = vmul.f32 0.5, %v342_v61 }
 0x1c1   : > { %v347_v0 = vadd.f32 %v346_v63, %v345_v62 }
 0x1c3   : > { %v348_v1 = vadd.f32 1e-06, %v347_v0 }
 0x1c5   : > { %567 = vrcp.f32 %v348_v1  ;;  %v360_v5 = vand.u32 2147483648, %v348_v1  ;;  %v358_v7 = vand.u32 2147483647, %v348_v1  ;;  %vm354_vm5 = vweird.f32 %v348_v1 }
 0x1c7   : > { %v361_v9 = vor.u32 1.1754944e-38, %v360_v5  ;;  %vm359_vm7 = vcmp.eq.f32.partialorder %v358_v7, 8.507059e+37 }
 0x1cb   : > { %v568_v2 = vpop.eup %567 }
 0x1cc   : > { %v350_v3 = vmul.f32 %v568_v2, %v348_v1  ;;  %vm355_vm4 = vweird.f32 %v568_v2 }
 0x1cd   : > { %vm356_vm6 = vmor %vm354_vm5, %vm355_vm4 }
 0x1ce   : > { %v351_v4 = vsub.f32 1.0, %v350_v3 }
 0x1d0   : > { %v352_v6 = vmul.f32 %v568_v2, %v351_v4 }
 0x1d2   : > { %v353_v8 = vadd.f32 %v568_v2, %v352_v6 }
 0x1d4   : > { %v357_v11 = vsel %vm356_vm6, %v568_v2, %v353_v8 }
 0x1d5   : > { %v362_v12 = vsel %vm359_vm7, %v361_v9, %v357_v11 }
 0x1d6   : > { %v363_v13 = vmul.f32 %v362_v12, %v343_v10 }
 0x1d8   : > { %364 = vst.msk [vmem:[%s219_s15] sm:$0x1] %vm226_vm0, %v363_v13 }
 0x1d9   : > { %656 = shalt.err (!%p653_p13)
}
 0x1da   : > { %499 = dma.vmem_to_hbm [thread:$0]  (%p785_p9), %s377_s16, 16, %s379_s18, %s366_s20  }
 0x1db PF: > { %s390_s29 = sand.u32 1, %s695_s9   ;;  %p509_p0 = pnand %p483_p12, %p792_p11 }
 0x1dc   : > { %s391_s4 = scalar_lea.sflag [#allocation7], %s390_s29 }
 0x1dd   : > { %p510_p1 = pneg %p509_p0 }
 0x1df   : > { %690 = dma.done.wait (%p510_p1), %s391_s4, 16  }
 0x1e0   : > { %692 = vsyncadd (%p510_p1), %s391_s4, 4294967280  ;;  %s21_s14 = sadd.s32 1, %s715_s14   ;;  %s894_s9 = smov %s699_s10 }
 0x1e1   : > { %p18_p2 = scmp.ge.s32.totalorder %s21_s14, 4   ;;  %s895_s10 = smov %s703_s11 }
 0x1e2   : > { %s896_s11 = smov %s790_s23  ;;  %s897_s12 = smov %s711_s13 }
 0x1e3   : > { %s898_s13 = smov %s900_s17  ;;  %20 = sbr.rel (!%p18_p2) target bundleno = 8 (0x8), region = 103 }
 0x1e8   :  { %396 = vsyncpa [#allocation6], 1 }
 0x1e9   :  { %398 = vsyncpa [#allocation6 + $0x1], 1 }
 0x1ea   :  { %399 = vsyncpa [#allocation9], 1 }
 0x1eb   :  { %401 = vsyncpa [#allocation9 + $0x1], 1 }
 0x1ec   :  { %402 = vsyncpa [#allocation7], 1 }
 0x1ed   :  { %404 = vsyncpa [#allocation7 + $0x1], 1 }

</bundles_post_ra>
